<compile_context>
chip_gen: v7x
topology: tpu7x:2x2x1
jax: 0.10.0
libtpu: 0.0.40
codegen_flags: <defaults>
</compile_context>

<pallas_src>
import functools

import jax
import jax.numpy as jnp
from jax import lax
from jax.experimental import pallas as pl
from jax.experimental.pallas import tpu as pltpu
import numpy as np

# ----------------------------- module config --------------------------------
DIM = 32          # input channels
NUM_VARS = 8      # codewords per group
GROUPS = 2
VQ_DIM = 64
VAR_DIM = VQ_DIM // GROUPS
COMBINE_GROUPS = False
TEMP = (2.0, 0.5, 0.999)     # (start, stop, decay) -> curr_temp = start at init

B, T = 2, 8
GV = GROUPS * NUM_VARS       # total codewords across groups (logit width)


def _round_up(a: int, b: int) -> int:
    return (a + b - 1) // b * b


# ------------------------------- kernel -------------------------------------
def _gvq_kernel(x_ref, w_ref, b_ref, cb_ref,          # inputs
                quant_ref, subword_ref, partial_ref,  # outputs
                *, n_valid, has_padding):
    # x_ref:       (rt, DIM)        compute dtype
    # w_ref:       (DIM, GV)        compute dtype   (weight_proj weight, transposed)
    # b_ref:       (1, GV)          f32             (weight_proj bias)
    # cb_ref:      (GV, VQ_DIM)     compute dtype   (block-diagonal codebook)
    # quant_ref:   (rt, VQ_DIM)     compute dtype   quantized output
    # subword_ref: (rt, GV)         compute dtype   hard one-hot output
    # partial_ref: (1, 8, 2*GV)     f32             per-tile [hard | soft] column sums
    i = pl.program_id(0)
    n_tiles = pl.num_programs(0)
    rt = x_ref.shape[0]

    # weight_proj: MXU matmul with f32 accumulation (+ bias in f32).
    logits = jnp.dot(x_ref[...], w_ref[...],
                     preferred_element_type=jnp.float32) + b_ref[...]   # (rt, GV)

    one_hots, softs = [], []
    for g in range(GROUPS):  # static unroll, GROUPS is small
        lg = logits[:, g * NUM_VARS:(g + 1) * NUM_VARS]                 # (rt, V)
        iota = lax.broadcasted_iota(jnp.int32, lg.shape, 1)
        row_max = jnp.max(lg, axis=-1, keepdims=True)
        # first index achieving the max (torch argmax tie-break semantics)
        first_idx = jnp.min(jnp.where(lg == row_max, iota, NUM_VARS),
                            axis=-1, keepdims=True)
        one_hots.append((iota == first_idx).astype(jnp.float32))
        # softmax over the group; divide -> EUP approximate reciprocal
        e = jnp.exp(lg - row_max)
        inv = pl.reciprocal(jnp.sum(e, axis=-1, keepdims=True), approx=True)
        softs.append(e * inv)

    one_hot = jnp.concatenate(one_hots, axis=-1)                        # (rt, GV)
    soft = jnp.concatenate(softs, axis=-1)                              # (rt, GV)

    # quantization: one MXU matmul of the one-hot against the block-diagonal
    # codebook; exact-width stores (no 128-lane slab, no wrapper slicing).
    quant = jnp.dot(one_hot.astype(cb_ref.dtype), cb_ref[...],
                    preferred_element_type=jnp.float32)
    quant_ref[...] = quant.astype(quant_ref.dtype)
    subword_ref[...] = one_hot.astype(subword_ref.dtype)

    def write_partials(oh, sf):
        sums = jnp.concatenate([jnp.sum(oh, axis=0, keepdims=True),
                                jnp.sum(sf, axis=0, keepdims=True)],
                               axis=-1)                                  # (1, 2*GV)
        partial_ref[...] = jnp.broadcast_to(sums, partial_ref.shape)

    if has_padding:
        # Only the last tile can contain padded rows; mask work is gated there.
        @pl.when(i == n_tiles - 1)
        def _masked():
            rid = i * rt + lax.broadcasted_iota(jnp.int32, (rt, 1), 0)
            valid = (rid < n_valid).astype(jnp.float32)                  # (rt, 1)
            write_partials(one_hot * valid, soft * valid)

        @pl.when(i != n_tiles - 1)
        def _full():
            write_partials(one_hot, soft)
    else:
        write_partials(one_hot, soft)


# ------------------------------ wrapper --------------------------------------
@functools.partial(jax.jit, static_argnames=("row_tile", "compute_dtype"))
def gumbel_vq_forward(x, w_proj, b_proj, codebook_vars, *,
                      row_tile=4096, compute_dtype=jnp.float32):
    """x: (B, T, DIM) float32 (time_first=True). Returns the forward() dict."""
    bsz, tsz, fsz = x.shape
    n = bsz * tsz
    x_flat = x.reshape(n, fsz)

    # row tile: multiple of 8 (16 for bf16 packed sublanes); pad rows to a
    # tile multiple (masked in-kernel, sliced off afterwards only if needed).
    sub_mult = 16 if compute_dtype == jnp.bfloat16 else 8
    rt = _round_up(min(row_tile, n), sub_mult)
    n_pad = _round_up(n, rt)
    has_padding = n_pad != n
    if has_padding:
        x_flat = jnp.pad(x_flat, ((0, n_pad - n), (0, 0)))
    n_tiles = n_pad // rt

    # block-diagonal codebook (GV, VQ_DIM): one_hot @ cb == concat of per-group
    # codeword selections.
    cb = jnp.zeros((GV, VQ_DIM), jnp.float32)
    for g in range(GROUPS):
        src = codebook_vars[g * NUM_VARS:(g + 1) * NUM_VARS]     # (V, VAR_DIM)
        cb = cb.at[g * NUM_VARS:(g + 1) * NUM_VARS,
                   g * VAR_DIM:(g + 1) * VAR_DIM].set(src)

    # bf16 MXU inputs / outputs (v6e/v7x production path); accumulation and
    # perplexity math stay f32 (v5e-safe).
    x_cast = x_flat.astype(compute_dtype)
    w_cast = w_proj.astype(compute_dtype)
    cb_cast = cb.astype(compute_dtype)

    kernel = functools.partial(_gvq_kernel, n_valid=n, has_padding=has_padding)

    itemsize = np.dtype(compute_dtype).itemsize
    cost = pl.CostEstimate(
        flops=2 * n_pad * fsz * GV + 2 * n_pad * GV * VQ_DIM,
        transcendentals=n_pad * (GV + GROUPS),
        bytes_accessed=(n_pad * fsz + fsz * GV + GV * VQ_DIM) * itemsize
                       + GV * 4
                       + (n_pad * VQ_DIM + n_pad * GV) * itemsize
                       + n_tiles * 8 * 2 * GV * 4,
    )

    quant, subword, partials = pl.pallas_call(
        kernel,
        out_shape=(
            jax.ShapeDtypeStruct((n_pad, VQ_DIM), compute_dtype),
            jax.ShapeDtypeStruct((n_pad, GV), compute_dtype),
            jax.ShapeDtypeStruct((n_tiles, 8, 2 * GV), jnp.float32),
        ),
        grid=(n_tiles,),
        in_specs=[
            pl.BlockSpec((rt, fsz), lambda i: (i, 0)),
            pl.BlockSpec((fsz, GV), lambda i: (0, 0)),
            pl.BlockSpec((1, GV), lambda i: (0, 0)),
            pl.BlockSpec((GV, VQ_DIM), lambda i: (0, 0)),
        ],
        out_specs=(
            pl.BlockSpec((rt, VQ_DIM), lambda i: (i, 0)),
            pl.BlockSpec((rt, GV), lambda i: (i, 0)),
            pl.BlockSpec((1, 8, 2 * GV), lambda i: (i, 0, 0)),
        ),
        compiler_params=pltpu.CompilerParams(
            # No carried state across tiles any more -> row axis is parallel
            # (shards across both TensorCores on v7x; neutral on v5e/v6e).
            dimension_semantics=("parallel",),
            vmem_limit_bytes=32 * 1024 * 1024,
        ),
        cost_estimate=cost,
    )(x_cast, w_cast, b_proj, cb_cast)

    # Perplexity finalize on the tiny (n_tiles, 2*GV) partial column sums.
    sums = jnp.sum(partials[:, 0, :], axis=0)                     # (2*GV,)
    inv_n = 1.0 / jnp.float32(n)
    hard_probs = (sums[:GV] * inv_n).reshape(GROUPS, NUM_VARS)
    avg_probs = (sums[GV:] * inv_n).reshape(GROUPS, NUM_VARS)
    code_ppl = jnp.exp(-jnp.sum(hard_probs * jnp.log(hard_probs + 1e-7), -1)).sum()
    prob_ppl = jnp.exp(-jnp.sum(avg_probs * jnp.log(avg_probs + 1e-7), -1)).sum()

    if has_padding:
        quant = quant[:n]
        subword = subword[:n]

    num_vars_total = NUM_VARS * GROUPS
    return {
        "num_vars": num_vars_total,
        "code_perplexity": code_ppl,
        "prob_perplexity": prob_ppl,
        "temp": TEMP[0],
        "subword_prob": subword.reshape(bsz, tsz, GV),
        "loss": (num_vars_total - prob_ppl) / num_vars_total,
        "x": quant.reshape(bsz, tsz, VQ_DIM),   # time_first=True
    }


# --------------------------- pure-JAX reference ------------------------------
def _reference_forward(x, w_proj, b_proj, codebook_vars):
    bsz, tsz, fsz = x.shape
    xf = x.reshape(-1, fsz)
    logits = xf @ w_proj + b_proj[0]                       # (N, GV)
    lg = logits.reshape(bsz * tsz, GROUPS, NUM_VARS)
    k = jnp.argmax(lg, axis=-1)
    hard = jax.nn.one_hot(k, NUM_VARS, dtype=jnp.float32)  # (N, G, V)
    hard_probs = hard.mean(axis=0)
    code_ppl = jnp.exp(-jnp.sum(hard_probs * jnp.log(hard_probs + 1e-7), -1)).sum()
    avg_probs = jax.nn.softmax(lg, axis=-1).mean(axis=0)
    prob_ppl = jnp.exp(-jnp.sum(avg_probs * jnp.log(avg_probs + 1e-7), -1)).sum()
    hard_flat = hard.reshape(bsz * tsz, GV)
    v = codebook_vars.reshape(GROUPS, NUM_VARS, VAR_DIM)
    q = jnp.einsum("ngv,gvd->ngd", hard, v).reshape(bsz, tsz, VQ_DIM)
    return hard_flat.reshape(bsz, tsz, GV), q, code_ppl, prob_ppl


# --------------------------------- main ---------------------------------------
if __name__ == "__main__":
    key = jax.random.PRNGKey(0)
    k_x, k_w, k_v, k_x2 = jax.random.split(key, 4)

    # deterministic synthetic parameters (matching module __init__ shapes):
    #   weight_proj: nn.Linear(DIM, GROUPS*NUM_VARS), weight ~ N(0,1), bias = 0
    #   vars:        (1, GROUPS*NUM_VARS, VAR_DIM), uniform(0,1)
    w_proj = jax.random.normal(k_w, (DIM, GV), dtype=jnp.float32)
    b_proj = jnp.zeros((1, GV), dtype=jnp.float32)
    codebook_vars = jax.random.uniform(k_v, (GV, VAR_DIM), dtype=jnp.float32)
    x = jax.random.normal(k_x, (B, T, DIM), dtype=jnp.float32)

    # ---- f32 path, row_tile=8 -> 2 grid tiles (cross-tile partials) ----------
    result = gumbel_vq_forward(x, w_proj, b_proj, codebook_vars,
                               row_tile=8, compute_dtype=jnp.float32)
    jax.block_until_ready(result)

    ref_sub, ref_q, ref_code, ref_prob = _reference_forward(
        x, w_proj, b_proj, codebook_vars)
    np.testing.assert_allclose(np.asarray(result["subword_prob"]),
                               np.asarray(ref_sub), atol=1e-6)
    np.testing.assert_allclose(np.asarray(result["x"]),
                               np.asarray(ref_q), rtol=1e-5, atol=1e-5)
    np.testing.assert_allclose(float(result["code_perplexity"]),
                               float(ref_code), rtol=1e-5)
    np.testing.assert_allclose(float(result["prob_perplexity"]),
                               float(ref_prob), rtol=5e-3)   # approx reciprocal

    # ---- padded-row path: N not a multiple of the tile (mask on last tile) ---
    x2 = jax.random.normal(k_x2, (2, 5, DIM), dtype=jnp.float32)
    result2 = gumbel_vq_forward(x2, w_proj, b_proj, codebook_vars,
                                compute_dtype=jnp.float32)
    jax.block_until_ready(result2)
    r_sub2, r_q2, r_code2, r_prob2 = _reference_forward(
        x2, w_proj, b_proj, codebook_vars)
    np.testing.assert_allclose(np.asarray(result2["subword_prob"]),
                               np.asarray(r_sub2), atol=1e-6)
    np.testing.assert_allclose(np.asarray(result2["x"]),
                               np.asarray(r_q2), rtol=1e-5, atol=1e-5)
    np.testing.assert_allclose(float(result2["code_perplexity"]),
                               float(r_code2), rtol=1e-5)
    np.testing.assert_allclose(float(result2["prob_perplexity"]),
                               float(r_prob2), rtol=5e-3)

    # ---- bf16 MXU-input/output path (v6e/v7x production choice) --------------
    # Loose check only: argmax near-ties may legitimately differ from f32, and
    # quantized outputs are bf16-rounded codebook rows.
    result_bf16 = gumbel_vq_forward(x, w_proj, b_proj, codebook_vars,
                                    compute_dtype=jnp.bfloat16)
    jax.block_until_ready(result_bf16)
    assert np.all(np.isfinite(np.asarray(result_bf16["x"], dtype=np.float32)))
    np.testing.assert_allclose(float(result_bf16["prob_perplexity"]),
                               float(ref_prob), rtol=5e-2)

    print("KERNEL_OK")
</pallas_src>

<mosaic_0001>
module attributes {stable_mosaic.version = 11 : i64} {
  func.func @_gvq_kernel(%arg0: i32, %arg1: memref<8x32xf32, #tpu.memory_space<vmem>>, %arg2: memref<32x16xf32, #tpu.memory_space<vmem>>, %arg3: memref<1x16xf32, #tpu.memory_space<vmem>>, %arg4: memref<16x64xf32, #tpu.memory_space<vmem>>, %arg5: memref<8x64xf32, #tpu.memory_space<vmem>>, %arg6: memref<8x16xf32, #tpu.memory_space<vmem>>, %arg7: memref<1x8x32xf32, #tpu.memory_space<vmem>>) attributes {dimension_semantics = [#tpu.dimension_semantics<parallel>], iteration_bounds = array<i64: 2>, scalar_prefetch = 0 : i64, scratch_operands = 0 : i64, tpu.core_type = #tpu.core_type<tc>, window_params = [{transform_indices = @transform_0, window_bounds = array<i64: 8, 32>}, {pipeline_mode = #tpu.pipeline_mode<synchronous>, transform_indices = @transform_1, window_bounds = array<i64: 32, 16>}, {pipeline_mode = #tpu.pipeline_mode<synchronous>, transform_indices = @transform_2, window_bounds = array<i64: 1, 16>}, {pipeline_mode = #tpu.pipeline_mode<synchronous>, transform_indices = @transform_3, window_bounds = array<i64: 16, 64>}, {transform_indices = @transform_4, window_bounds = array<i64: 8, 64>}, {transform_indices = @transform_5, window_bounds = array<i64: 8, 16>}, {transform_indices = @transform_6, window_bounds = array<i64: 1, 8, 32>}]} {
    %c0 = arith.constant 0 : index
    %c0_0 = arith.constant 0 : index
    %0 = vector.load %arg1[%c0, %c0_0] : memref<8x32xf32, #tpu.memory_space<vmem>>, vector<8x32xf32>
    %c0_1 = arith.constant 0 : index
    %c0_2 = arith.constant 0 : index
    %1 = vector.load %arg2[%c0_1, %c0_2] : memref<32x16xf32, #tpu.memory_space<vmem>>, vector<32x16xf32>
    %cst = arith.constant dense<0.000000e+00> : vector<8x16xf32>
    %2 = tpu.matmul %0, %1, %cst {dimension_numbers = #tpu.dot_dimension_numbers<[1], [0], [0], [1], [0, 0, 1, 1], [], []>} : vector<8x32xf32>, vector<32x16xf32>, vector<8x16xf32> -> vector<8x16xf32>
    %c0_3 = arith.constant 0 : index
    %c0_4 = arith.constant 0 : index
    %3 = vector.load %arg3[%c0_3, %c0_4] : memref<1x16xf32, #tpu.memory_space<vmem>>, vector<1x16xf32>
    %4 = vector.broadcast %3 : vector<1x16xf32> to vector<8x16xf32>
    %5 = arith.addf %2, %4 : vector<8x16xf32>
    %6 = vector.extract_strided_slice %5 {offsets = [0, 0], sizes = [8, 8], strides = [1, 1]} : vector<8x16xf32> to vector<8x8xf32>
    %7 = tpu.iota {dimensions = array<i32: 1>} : vector<8x8xi32>
    %cst_5 = arith.constant dense<0xFF800000> : vector<8xf32>
    %8 = vector.multi_reduction <maximumf>, %6, %cst_5 [1] : vector<8x8xf32> to vector<8xf32>
    %9 = vector.shape_cast %8 : vector<8xf32> to vector<8x1xf32>
    %10 = vector.broadcast %9 : vector<8x1xf32> to vector<8x8xf32>
    %11 = arith.cmpf oeq, %6, %10 : vector<8x8xf32>
    %c8_i32 = arith.constant 8 : i32
    %12 = vector.broadcast %c8_i32 : i32 to vector<8x8xi32>
    %13 = arith.select %11, %7, %12 : vector<8x8xi1>, vector<8x8xi32>
    %cst_6 = arith.constant dense<2147483647> : vector<8xi32>
    %14 = vector.multi_reduction <minsi>, %13, %cst_6 [1] : vector<8x8xi32> to vector<8xi32>
    %15 = vector.shape_cast %14 : vector<8xi32> to vector<8x1xi32>
    %16 = vector.broadcast %15 : vector<8x1xi32> to vector<8x8xi32>
    %17 = arith.cmpi eq, %7, %16 : vector<8x8xi32>
    %18 = arith.extui %17 : vector<8x8xi1> to vector<8x8xi32>
    %19 = arith.sitofp %18 : vector<8x8xi32> to vector<8x8xf32>
    %20 = vector.broadcast %9 : vector<8x1xf32> to vector<8x8xf32>
    %21 = arith.subf %6, %20 : vector<8x8xf32>
    %22 = math.exp %21 : vector<8x8xf32>
    %cst_7 = arith.constant dense<0.000000e+00> : vector<8xf32>
    %23 = vector.multi_reduction <add>, %22, %cst_7 [1] : vector<8x8xf32> to vector<8xf32>
    %24 = vector.shape_cast %23 : vector<8xf32> to vector<8x1xf32>
    %25 = tpu.reciprocal %24 {approx = true} : vector<8x1xf32> -> vector<8x1xf32>
    %26 = vector.broadcast %25 : vector<8x1xf32> to vector<8x8xf32>
    %27 = arith.mulf %22, %26 : vector<8x8xf32>
    %28 = vector.extract_strided_slice %5 {offsets = [0, 8], sizes = [8, 8], strides = [1, 1]} : vector<8x16xf32> to vector<8x8xf32>
    %29 = tpu.iota {dimensions = array<i32: 1>} : vector<8x8xi32>
    %cst_8 = arith.constant dense<0xFF800000> : vector<8xf32>
    %30 = vector.multi_reduction <maximumf>, %28, %cst_8 [1] : vector<8x8xf32> to vector<8xf32>
    %31 = vector.shape_cast %30 : vector<8xf32> to vector<8x1xf32>
    %32 = vector.broadcast %31 : vector<8x1xf32> to vector<8x8xf32>
    %33 = arith.cmpf oeq, %28, %32 : vector<8x8xf32>
    %c8_i32_9 = arith.constant 8 : i32
    %34 = vector.broadcast %c8_i32_9 : i32 to vector<8x8xi32>
    %35 = arith.select %33, %29, %34 : vector<8x8xi1>, vector<8x8xi32>
    %cst_10 = arith.constant dense<2147483647> : vector<8xi32>
    %36 = vector.multi_reduction <minsi>, %35, %cst_10 [1] : vector<8x8xi32> to vector<8xi32>
    %37 = vector.shape_cast %36 : vector<8xi32> to vector<8x1xi32>
    %38 = vector.broadcast %37 : vector<8x1xi32> to vector<8x8xi32>
    %39 = arith.cmpi eq, %29, %38 : vector<8x8xi32>
    %40 = arith.extui %39 : vector<8x8xi1> to vector<8x8xi32>
    %41 = arith.sitofp %40 : vector<8x8xi32> to vector<8x8xf32>
    %42 = vector.broadcast %31 : vector<8x1xf32> to vector<8x8xf32>
    %43 = arith.subf %28, %42 : vector<8x8xf32>
    %44 = math.exp %43 : vector<8x8xf32>
    %cst_11 = arith.constant dense<0.000000e+00> : vector<8xf32>
    %45 = vector.multi_reduction <add>, %44, %cst_11 [1] : vector<8x8xf32> to vector<8xf32>
    %46 = vector.shape_cast %45 : vector<8xf32> to vector<8x1xf32>
    %47 = tpu.reciprocal %46 {approx = true} : vector<8x1xf32> -> vector<8x1xf32>
    %48 = vector.broadcast %47 : vector<8x1xf32> to vector<8x8xf32>
    %49 = arith.mulf %44, %48 : vector<8x8xf32>
    %50 = tpu.concatenate %19, %41 in 1 : vector<8x8xf32>, vector<8x8xf32> -> vector<8x16xf32>
    %51 = tpu.concatenate %27, %49 in 1 : vector<8x8xf32>, vector<8x8xf32> -> vector<8x16xf32>
    %c0_12 = arith.constant 0 : index
    %c0_13 = arith.constant 0 : index
    %52 = vector.load %arg4[%c0_12, %c0_13] : memref<16x64xf32, #tpu.memory_space<vmem>>, vector<16x64xf32>
    %cst_14 = arith.constant dense<0.000000e+00> : vector<8x64xf32>
    %53 = tpu.matmul %50, %52, %cst_14 {dimension_numbers = #tpu.dot_dimension_numbers<[1], [0], [0], [1], [0, 0, 1, 1], [], []>} : vector<8x16xf32>, vector<16x64xf32>, vector<8x64xf32> -> vector<8x64xf32>
    %c0_15 = arith.constant 0 : index
    %c0_16 = arith.constant 0 : index
    %54 = vector.load %arg5[%c0_15, %c0_16] : memref<8x64xf32, #tpu.memory_space<vmem>>, vector<8x64xf32>
    tpu.vector_store %arg5[%c0_15, %c0_16], %53 {strides = array<i32>} : memref<8x64xf32, #tpu.memory_space<vmem>>, vector<8x64xf32>,
    %c0_17 = arith.constant 0 : index
    %c0_18 = arith.constant 0 : index
    %55 = vector.load %arg6[%c0_17, %c0_18] : memref<8x16xf32, #tpu.memory_space<vmem>>, vector<8x16xf32>
    tpu.vector_store %arg6[%c0_17, %c0_18], %50 {strides = array<i32>} : memref<8x16xf32, #tpu.memory_space<vmem>>, vector<8x16xf32>,
    %cst_19 = arith.constant dense<0.000000e+00> : vector<16xf32>
    %56 = vector.multi_reduction <add>, %50, %cst_19 [0] : vector<8x16xf32> to vector<16xf32>
    %57 = vector.shape_cast %56 : vector<16xf32> to vector<1x16xf32>
    %cst_20 = arith.constant dense<0.000000e+00> : vector<16xf32>
    %58 = vector.multi_reduction <add>, %51, %cst_20 [0] : vector<8x16xf32> to vector<16xf32>
    %59 = vector.shape_cast %58 : vector<16xf32> to vector<1x16xf32>
    %60 = tpu.concatenate %57, %59 in 1 : vector<1x16xf32>, vector<1x16xf32> -> vector<1x32xf32>
    %61 = vector.shape_cast %60 : vector<1x32xf32> to vector<1x1x32xf32>
    %62 = vector.broadcast %61 : vector<1x1x32xf32> to vector<1x8x32xf32>
    %c0_21 = arith.constant 0 : index
    %c0_22 = arith.constant 0 : index
    %c0_23 = arith.constant 0 : index
    %63 = vector.load %arg7[%c0_21, %c0_22, %c0_23] : memref<1x8x32xf32, #tpu.memory_space<vmem>>, vector<1x8x32xf32>
    tpu.vector_store %arg7[%c0_21, %c0_22, %c0_23], %62 {strides = array<i32>} : memref<1x8x32xf32, #tpu.memory_space<vmem>>, vector<1x8x32xf32>,
    return
  }
  func.func @transform_0(%arg0: i32) -> (i32, i32) {
    %c0_i32 = arith.constant 0 : i32
    %c0_i32_0 = arith.constant 0 : i32
    return %arg0, %c0_i32 : i32, i32
  }
  func.func @transform_1(%arg0: i32) -> (i32, i32) {
    %c0_i32 = arith.constant 0 : i32
    %c0_i32_0 = arith.constant 0 : i32
    %c0_i32_1 = arith.constant 0 : i32
    return %c0_i32, %c0_i32_0 : i32, i32
  }
  func.func @transform_2(%arg0: i32) -> (i32, i32) {
    %c0_i32 = arith.constant 0 : i32
    %c0_i32_0 = arith.constant 0 : i32
    %c0_i32_1 = arith.constant 0 : i32
    return %c0_i32, %c0_i32_0 : i32, i32
  }
  func.func @transform_3(%arg0: i32) -> (i32, i32) {
    %c0_i32 = arith.constant 0 : i32
    %c0_i32_0 = arith.constant 0 : i32
    %c0_i32_1 = arith.constant 0 : i32
    return %c0_i32, %c0_i32_0 : i32, i32
  }
  func.func @transform_4(%arg0: i32) -> (i32, i32) {
    %c0_i32 = arith.constant 0 : i32
    %c0_i32_0 = arith.constant 0 : i32
    return %arg0, %c0_i32 : i32, i32
  }
  func.func @transform_5(%arg0: i32) -> (i32, i32) {
    %c0_i32 = arith.constant 0 : i32
    %c0_i32_0 = arith.constant 0 : i32
    return %arg0, %c0_i32 : i32, i32
  }
  func.func @transform_6(%arg0: i32) -> (i32, i32, i32) {
    %c0_i32 = arith.constant 0 : i32
    %c0_i32_0 = arith.constant 0 : i32
    %c0_i32_1 = arith.constant 0 : i32
    return %arg0, %c0_i32, %c0_i32_0 : i32, i32, i32
  }
}

</mosaic_0001>

<bundles_post_ra>
// kernel: gumbel_vq_forward.1
= control target key start
LH: loop header
LB: loop body
LE: loop exit
PB: predicated region body
PF: predicated region fallthrough
CT: control target
= control target key end

     0   :  { %12 = vsyncpa [#allocation3], 0  ;;  %s1141_s0 = inlined_call_operand.vmem [shape: f32[16,32], index: 0, kind: input, shape index: {}]   ;;  %s1142_s1 = inlined_call_operand.vmem [shape: f32[32,16], index: 1, kind: input, shape index: {}]   ;;  %s1143_s2 = inlined_call_operand.vmem [shape: f32[1,16], index: 2, kind: input, shape index: {}]   ;;  %s1144_s3 = inlined_call_operand.vmem [shape: f32[16,64], index: 3, kind: input, shape index: {}]   ;;  %s1145_s4 = inlined_call_operand.hbm [shape: f32[16,64], index: 4, kind: output, shape index: {0}]   ;;  %s1146_s5 = inlined_call_operand.hbm [shape: f32[16,16], index: 5, kind: output, shape index: {1}]   ;;  %s1147_s6 = inlined_call_operand.vmem [shape: f32[2,8,32], index: 6, kind: output, shape index: {2}]  }
   0x1   :  { %14 = vsyncpa [#allocation3 + $0x1], 0 }
   0x2   :  { %15 = vsyncpa [#allocation5], 0 }
   0x3   :  { %17 = vsyncpa [#allocation5 + $0x1], 0  ;;  %s940_s21 = smov 0   ;;  %s942_s22 = smov 0  }
   0x4   :  { %s944_s23 = smov 0   ;;  %s946_s24 = smov 0  }
   0x5 LB: > { %s961_s25 = sadd.s32 4294967295, %s895_s24   ;;  %s689_s26 = sadd.s32 4294967294, %s895_s24   ;;  %s895_s24 = sphi %s946_s24, %s1155_s24   ;;  %s891_s23 = sphi %s944_s23, %s1154_s23   ;;  %s887_s22 = sphi %s942_s22, %s1153_s22   ;;  %s883_s21 = sphi %s940_s21, %s1152_s21  }
   0x6   : > { %s965_s27 = sadd.s32 1, %s895_s24   ;;  %s119_s28 = sadd.s32 1, %s891_s23 }
   0x7   : > { %s116_s29 = ssub.s32 %s895_s24, %s965_s27  ;;  %p129_p0 = scmp.ne.s32.totalorder %s891_s23, %s887_s22 }
   0x8   : > { %p117_p1 = scmp.eq.s32.totalorder %s116_s29, 0  ;;  %p130_p2 = scmp.eq.s32.totalorder %s961_s25, 1 }
   0x9   : > { %p135_p3 = scmp.ne.s32.totalorder %s887_s22, %s883_s21  ;;  %p136_p4 = scmp.eq.s32.totalorder %s689_s26, 1 }
   0xa   : > { %s976_s30 = scalar_select %p117_p1, %s891_s23, %s119_s28  }
   0xb   : > { %p978_p5 = por %p130_p2, %p129_p0  ;;  %p982_p6 = por %p136_p4, %p135_p3 }
   0xc   : > { %p692_p7 = scmp.ge.s32.totalorder %s895_s24, 1  ;;  %p222_p8 = scmp.lt.s32.totalorder %s895_s24, 3 }
   0xe   : > { %p223_p9 = pnand %p692_p7, %p222_p8 }
   0xf   : > { %v269_v0 = vld [vmem:[%s1142_s1] sm:$0xff] (!%p223_p9)  ;;  %v270_v1 = vld [vmem:[%s1142_s1 + $0x8] sm:$0xff] (!%p223_p9)  ;;  %v271_v2 = vld [vmem:[%s1142_s1 + $0x10] sm:$0xff] (!%p223_p9)  ;;  %v897_v3 = vmov (!%p223_p9), 0.0|0.0   ;;  %vm898_vm0 = vmmov (!%p223_p9), 0   ;;  %v899_v6 = vmov (!%p223_p9), 0.0   ;;  %v354_v15 = vlaneseq (!%p223_p9) }
  0x10   : > { %226 = sbr.rel (%p223_p9) target bundleno = 1029 (0x405), region = 36  ;;  %734 = vmatprep.subr.bf16.mxu0 (!%p223_p9), %v897_v3  ;;  %v735_v4 = vpack.c.bf16 (!%p223_p9), %v270_v1, %v269_v0  ;;  %v272_v5 = vld [vmem:[%s1142_s1 + $0x18] sm:$0xff] (!%p223_p9)  ;;  %724 = vmatprep.mubr.msk.f32.mxu0 (!%p223_p9), %vm898_vm0, %v899_v6  ;;  %p260_p10 = scmp.lt.s32.totalorder (!%p223_p9), %s961_s25, 1  ;;  %vm280_vm1 = vcmask (!%p223_p9), 261120   ;;  %v697_v9 = vld [vmem:[%s1143_s2] ss:$0 sm:$0xff] (!%p223_p9) }
  0x11   : > { %740 = vmatprep.subr.bf16.mxu1 (!%p223_p9), %v897_v3  ;;  %731 = vmatprep.mubr.msk.f32.mxu1 (!%p223_p9), %vm898_vm0, %v899_v6  ;;  %v738_v7 = vpack.c.bf16 (!%p223_p9), %v272_v5, %v271_v2  ;;  %vm388_vm2 = vcmask (!%p223_p9), 130112   ;;  %vm356_vm3 = vcmask (!%p223_p9), 64512   ;;  %v1019_v16 = vand.u32 (!%p223_p9), 127, %v354_v15  ;;  %s900_s9 = smov (!%p223_p9), 8   ;;  %s901_s10 = smov (!%p223_p9), 120   ;;  %v432_v43 = vld [vmem:[%s1144_s3] sm:$0xff] (!%p223_p9) }
  0x12   : > { %736 = vmatpush3.bf16.msra.mxu0 (!%p223_p9), %v735_v4  ;;  %v433_v44 = vld [vmem:[%s1144_s3 + $0x8] sm:$0xff] (!%p223_p9)  ;;  %s1038_s15 = sand.u32 (!%p223_p9), 1, %s887_s22   ;;  %vm434_vm10 = vcmask (!%p223_p9), 130048   ;;  %s1148_s20 = sshll.u32 (!%p223_p9), %s961_s25, 7 }
  0x13   : > { %737 = vmatprep.subr.bf16.mxu0 (!%p223_p9), %v897_v3  ;;  %v741_v45 = vpack.c.bf16 (!%p223_p9), %v433_v44, %v432_v43  ;;  %s693_s16 = sshll.u32 (!%p223_p9), %s1038_s15, 3  ;;  %s1056_s29 = scalar_lea.hbm (!%p223_p9), %s1146_s5, %s1148_s20 }
  0x14   : > { %s253_s19 = scalar_lea.vmem (!%p223_p9), [#allocation4], %s693_s16  ;;  %s541_s11 = scalar_lea.sflag (!%p223_p9), [#allocation5], %s1038_s15 }
  0x15   : > { %742 = vmatpush3.bf16.msra.mxu1 (!%p223_p9), %v741_v45  ;;  %s903_s13 = smov (!%p223_p9), [#allocation4]  }
  0x16   : > { %739 = vmatpush3.bf16.msra.mxu0 (!%p223_p9), %v738_v7  ;;  %s805_s14 = sshll.u32 (!%p223_p9), %s903_s13, 4  ;;  %s806_s14 = int_to_ptr.vmem [resolvable:$false] %s805_s14 }
  0x17   : > { %s1004_s17 = scalar_select %p260_p10, %s961_s25, 1 }
  0x19   : > { %s695_s18 = sshll.u32 %s1004_s17, 3 }
  0x1a   : > { %s263_s26 = scalar_lea.vmem %s1141_s0, %s695_s18 }
  0x1b   : > { %v268_v8 = vld [vmem:[%s263_s26] sm:$0xff]  ;;  %s807_s26 = scalar_lea.vmem %s806_s14, 256 }
  0x1c   : > { %725 = vmatmul.mubr.msk.f32.vlgmr.msra.gmra.mrb[0].mxu0 %vm280_vm1, %v268_v8 }
  0xef   : > { %v350_v10 = vpop.f32.mrb[0].mxu0 }
  0xf0   : > { %v351_v11 = vadd.f32 %v697_v9, %v350_v10  ;;  %v726_v12 = vpop.f32.mrb[1].mxu0 }
  0xf2   : > { %v389_v13 = vsel %vm388_vm2, %v351_v11, -inf  ;;  %v357_v14 = vsel %vm356_vm3, %v351_v11, -inf }
  0xf3   : > { %390 = vmax.xlane.f32.xlu0 %v389_v13  ;;  %358 = vmax.xlane.f32.xlu1 %v357_v14 }
 0x109   : > { %393 = vrot.lane.b32.xlu0 %v1019_v16, %s900_s9 }
 0x180   : > { %v391_v17 = vpop.xlane.xlu0 %390  ;;  %v359_v18 = vpop.xlane.xlu1 %358 }
 0x181   : > { %v414_v19 = vsub.f32 %v351_v11, %v391_v17  ;;  %vm360_vm4 = vcmp.eq.f32.partialorder %v351_v11, %v359_v18  ;;  %vm392_vm5 = vcmp.eq.f32.partialorder %v351_v11, %v391_v17  ;;  %v380_v31 = vsub.f32 %v351_v11, %v359_v18 }
 0x182   : > { %v361_v21 = vsel %vm360_vm4, %v1019_v16, 8 }
 0x183   : > { %v415_v20 = vmul.f32 1.442695, %v414_v19  ;;  %v362_v25 = vsel %vm356_vm3, %v361_v21, 2147483647  ;;  %v381_v32 = vmul.f32 1.442695, %v380_v31 }
 0x184   : > { %v394_v22 = vpop.permute.xlu0 %393  ;;  %v364_v28 = vshra.s32 %v362_v25, 16  ;;  %v363_v38 = vand.u32 65535, %v362_v25 }
 0x185   : > { %793 = vpow2.f32 %v415_v20  ;;  %v395_v23 = vsel %vm392_vm5, %v394_v22, 8 }
 0x186   : > { %v396_v24 = vsel %vm388_vm2, %v395_v23, 2147483647  ;;  %v366_v29 = vcvt.s32.f32 %v364_v28  ;;  %795 = vpow2.f32 %v381_v32  ;;  %v365_v41 = vcvt.s32.f32 %v363_v38 }
 0x187   : > { %v398_v26 = vshra.s32 %v396_v24, 16  ;;  %v397_v35 = vand.u32 65535, %v396_v24 }
 0x189   : > { %v400_v27 = vcvt.s32.f32 %v398_v26  ;;  %v399_v37 = vcvt.s32.f32 %v397_v35 }
 0x18b   : > { %401 = vmin.xlane.f32.xlu1 %v400_v27 }
 0x18f   : > { %v794_v30 = vpop.eup %793  ;;  %367 = vmin.xlane.f32.xlu1 %v366_v29 }
 0x190   : > { %418 = vrot.lane.b32.xlu0 %v794_v30, %s901_s10  ;;  %v796_v33 = vpop.eup %795  ;;  %s902_s10 = smov 16  }
 0x191   : > { %v383_v34 = vsel %vm356_vm3, %v796_v33, 0.0 }
 0x1af   : > { %384 = vadd.xlane.f32.xlu0 %v383_v34 }
 0x202   : > { %v419_v52 = vpop.permute.xlu0 %418 }
 0x203   : > { %v421_v53 = vsel %vm356_vm3, %v419_v52, 0.0 }
 0x218   : > { %v402_v36 = vpop.xlane.xlu1 %401 }
 0x219   : > { %vm403_vm6 = vcmp.eq.f32.partialorder %v400_v27, %v402_v36  ;;  %v408_v46 = vcvt.f32.s32 %v402_v36 }
 0x21a   : > { %v404_v39 = vsel %vm403_vm6, %v399_v37, inf }
 0x21b   : > { %405 = vmin.xlane.f32.xlu1 %v404_v39  ;;  %v409_v48 = vshll.u32 %v408_v46, 16 }
 0x21c   : > { %v368_v40 = vpop.xlane.xlu1 %367 }
 0x21d   : > { %vm369_vm7 = vcmp.eq.f32.partialorder %v366_v29, %v368_v40  ;;  %v374_v55 = vcvt.f32.s32 %v368_v40 }
 0x21e   : > { %v370_v42 = vsel %vm369_vm7, %v365_v41, inf }
 0x21f   : > { %371 = vmin.xlane.f32.xlu1 %v370_v42  ;;  %v375_v57 = vshll.u32 %v374_v55, 16 }
 0x23c   : > { %v385_v62 = vpop.xlane.xlu0 %384 }
 0x23d   : > { %797 = vrcp.f32 %v385_v62 }
 0x247   : > { %v798_v0 = vpop.eup %797 }
 0x248   : > { %v387_v2 = vmul.f32 %v798_v0, %v796_v33 }
 0x2a8   : > { %v406_v47 = vpop.xlane.xlu1 %405 }
 0x2a9   : > { %v407_v49 = vcvt.f32.s32 %v406_v47 }
 0x2ab   : > { %v410_v50 = vadd.s32 %v409_v48, %v407_v49 }
 0x2ac   : > { %v372_v54 = vpop.xlane.xlu1 %371 }
 0x2ad   : > { %vm411_vm8 = vcmp.eq.s32.totalorder %v1019_v16, %v410_v50  ;;  %v373_v56 = vcvt.f32.s32 %v372_v54 }
 0x2ae   : > { %v700_v51 = vsel %vm411_vm8, 1.0, %v899_v6 }
 0x2af   : > { %427 = vrot.lane.b32.xlu1 %v700_v51, %s900_s9  ;;  %v376_v58 = vadd.s32 %v375_v57, %v373_v56  ;;  %s571_s9 = sshll.u32 %s253_s19, 4  ;;  %s1058_s9 = int_to_ptr.vmem [resolvable:$true] %s571_s9 }
 0x2b0   : > { %s801_s12 = scalar_lea.vmem %s1058_s9, 128  ;;  %p808_p0 = scmp.lt.s32.totalorder %s1058_s9, %s806_s14 }
 0x2b1   : > { %vm377_vm9 = vcmp.eq.s32.totalorder %v1019_v16, %v376_v58  ;;  %p802_p11 = scmp.ne.s32.totalorder %s1058_s9, %s801_s12  ;;  %p809_p1 = scmp.lt.s32.totalorder %s807_s26, %s801_s12 }
 0x2b2   : > { %v699_v59 = vsel %vm377_vm9, 1.0, %v899_v6 }
 0x2b3   : > { %p803_p12 = pnand %p802_p11, %p978_p5  ;;  %p810_p2 = por %p809_p1, %p808_p0 }
 0x2b5   : > { %p804_p13 = pneg %p803_p12 }
 0x2b7   : > { %p811_p3 = pnand %p810_p2, %p804_p13 }
 0x2d3   : > { %422 = vadd.xlane.f32.xlu1 %v421_v53 }
 0x321   : > { %v428_v60 = vpop.permute.xlu1 %427 }
 0x322   : > { %v430_v61 = vsel %vm356_vm3, %v699_v59, %v428_v60 }
 0x323   : > { %732 = vmatmul.mubr.msk.f32.vlgmr.msra.gmra.mrb[0].mxu1 %vm434_vm10, %v430_v61  ;;  %510 = vst.msk [vmem:[%s253_s19] sm:$0xff] %vm434_vm10, %v430_v61 }
 0x360   : > { %v423_v63 = vpop.xlane.xlu1 %422 }
 0x361   : > { %799 = vrcp.f32 %v423_v63 }
 0x36b   : > { %v800_v1 = vpop.eup %799 }
 0x36c   : > { %v425_v3 = vmul.f32 %v800_v1, %v794_v30 }
 0x36e   : > { %v431_v4 = vsel %vm356_vm3, %v387_v2, %v425_v3 }
 0x36f   : > { %v518_v5 = vsel %vm434_vm10, %v431_v4, 0.0 }
 0x370   : > { %v519_v6 = vrot.slane %v518_v5, 4 }
 0x372   : > { %v520_v7 = vadd.f32 %v519_v6, %v518_v5 }
 0x374   : > { %v521_v8 = vrot.slane %v520_v7, 2 }
 0x376   : > { %v522_v9 = vadd.f32 %v521_v8, %v520_v7 }
 0x378   : > { %v523_v10 = vrot.slane %v522_v9, 1 }
 0x37a   : > { %v524_v11 = vadd.f32 %v523_v10, %v522_v9 }
 0x37c   : > { %526 = vrot.lane.b32.xlu0 %v524_v11, %s902_s10 }
 0x37d   : > { %814 = shalt.err (!%p811_p3)
}
 0x37e   : > { %s815_s19 = scalar_lea.hbm %s1056_s29, 128  ;;  %s819_s13 = scalar_lea.hbm %s1146_s5, 256 }
 0x37f   : > { %p816_p4 = scmp.ne.s32.totalorder %s1056_s29, %s815_s19  ;;  %p820_p9 = scmp.lt.u32.totalorder %s1056_s29, %s1146_s5 }
 0x380   : > { %p821_p10 = scmp.lt.u32.totalorder %s819_s13, %s815_s19  ;;  %p823_p12 = scmp.lt.u32.totalorder %s815_s19, %s1056_s29 }
 0x381   : > { %p817_p7 = pnand %p816_p4, %p978_p5 }
 0x382   : > { %p822_p11 = por %p821_p10, %p820_p9 }
 0x383   : > { %p818_p8 = pneg %p817_p7 }
 0x384   : > { %p824_p13 = por %p823_p12, %p822_p11 }
 0x386   : > { %p825_p0 = pnand %p824_p13, %p818_p8 }
 0x388   : > { %828 = shalt.err (!%p825_p0)
}
 0x389   : > { %744 = dma.vmem_to_hbm [thread:$0]  (%p978_p5), %s1058_s9, 128, %s1056_s29, %s541_s11   ;;  %v511_v12 = vsel %vm434_vm10, %v430_v61, 0.0  ;;  %v531_v18 = vshrl.u32 %v354_v15, 7  ;;  %vm508_vm11 = vcmask 523264  }
 0x38a   : > { %v512_v13 = vrot.slane %v511_v12, 4  ;;  %s267_s29 = scalar_lea.vmem %s1147_s6, %s695_s18  ;;  %s246_s9 = scalar_lea.vmem [#allocation2], %s693_s16 }
 0x38b   : > { %v532_v20 = vsub.s32 0, %v531_v18  ;;  %s558_s11 = sshll.u32 %s246_s9, 4  ;;  %s1151_s26 = sshll.u32 %s961_s25, 7  ;;  %s1100_s11 = int_to_ptr.vmem [resolvable:$true] %s558_s11 }
 0x38c   : > { %v513_v14 = vadd.f32 %v512_v13, %v511_v12  ;;  %s1098_s10 = scalar_lea.hbm %s1145_s4, %s1151_s26  ;;  %s536_s17 = scalar_lea.sflag [#allocation3], %s1038_s15 }
 0x38d   : > { %s829_s18 = scalar_lea.vmem %s1100_s11, 128  ;;  %s904_s25 = smov [#allocation2]  }
 0x38e   : > { %v514_v16 = vrot.slane %v513_v14, 2  ;;  %p830_p1 = scmp.ne.s32.totalorder %s1100_s11, %s829_s18  ;;  %s833_s16 = sshll.u32 %s904_s25, 4  ;;  %s834_s16 = int_to_ptr.vmem [resolvable:$false] %s833_s16 }
 0x38f   : > { %s835_s13 = scalar_lea.vmem %s834_s16, 256  ;;  %p836_p4 = scmp.lt.s32.totalorder %s1100_s11, %s834_s16 }
 0x390   : > { %v515_v17 = vadd.f32 %v514_v16, %v513_v14  ;;  %p831_p2 = pnand %p830_p1, %p978_p5  ;;  %p837_p7 = scmp.lt.s32.totalorder %s835_s13, %s829_s18 }
 0x392   : > { %v516_v19 = vrot.slane %v515_v17, 1  ;;  %p832_p3 = pneg %p831_p2  ;;  %p838_p8 = por %p837_p7, %p836_p4 }
 0x394   : > { %v517_v21 = vadd.f32 %v516_v19, %v515_v17  ;;  %p839_p9 = pnand %p838_p8, %p832_p3 }
 0x3ee   : > { %v527_v22 = vpop.permute.xlu0 %526 }
 0x3ef   : > { %v529_v23 = vsel %vm434_vm10, %v517_v21, %v527_v22 }
 0x3f0   : > { %v533_v24 = vrot.slane %v529_v23, %v532_v20 }
 0x3f2   : > { %534 = vst.msk [vmem:[%s267_s29] sm:$0xff] %vm280_vm1, %v533_v24 }
 0x3f6   : > { %v504_v15 = vpop.f32.mrb[0].mxu1 }
 0x3f7   : > { %509 = vst.msk [vmem:[%s246_s9] sm:$0xff] %vm508_vm11, %v504_v15  ;;  %v733_v25 = vpop.f32.mrb[1].mxu1 }
 0x3f8   : > { %842 = shalt.err (!%p839_p9)
}
 0x3f9   : > { %s843_s15 = scalar_lea.hbm %s1098_s10, 128  ;;  %s847_s12 = scalar_lea.hbm %s1145_s4, 256 }
 0x3fa   : > { %p844_p10 = scmp.ne.s32.totalorder %s1098_s10, %s843_s15  ;;  %p848_p13 = scmp.lt.u32.totalorder %s1098_s10, %s1145_s4 }
 0x3fb   : > { %p849_p0 = scmp.lt.u32.totalorder %s847_s12, %s843_s15  ;;  %p851_p2 = scmp.lt.u32.totalorder %s843_s15, %s1098_s10 }
 0x3fc   : > { %p845_p11 = pnand %p844_p10, %p978_p5 }
 0x3fd   : > { %p850_p1 = por %p849_p0, %p848_p13 }
 0x3fe   : > { %p846_p12 = pneg %p845_p11 }
 0x3ff   : > { %p852_p3 = por %p851_p2, %p850_p1 }
 0x401   : > { %p853_p4 = pnand %p852_p3, %p846_p12 }
 0x403   : > { %856 = shalt.err (!%p853_p4)
}
 0x404   : > { %743 = dma.vmem_to_hbm [thread:$0]  (%p978_p5), %s1100_s11, 128, %s1098_s10, %s536_s17  }
 0x405 PF: > { %p754_p7 = scmp.ge.s32.totalorder %s895_s24, 2  ;;  %s586_s26 = sand.u32 1, %s883_s21  }
 0x406   : > { %s587_s19 = scalar_lea.sflag [#allocation3], %s586_s26 }
 0x407   : > { %p748_p8 = pnand %p754_p7, %p982_p6 }
 0x409   : > { %874 = dma.done.wait (!%p748_p8), %s587_s19, 128  }
 0x40a   : > { %876 = vsyncadd (!%p748_p8), %s587_s19, 4294967168  ;;  %s596_s28 = scalar_lea.sflag [#allocation5], %s586_s26 }
 0x40b   : > { %878 = dma.done.wait (!%p748_p8), %s596_s28, 128  }
 0x40c   : > { %880 = vsyncadd (!%p748_p8), %s596_s28, 4294967168  ;;  %p20_p5 = scmp.ge.s32.totalorder %s965_s27, 4   ;;  %s1152_s21 = smov %s887_s22 }
 0x40d   : > { %s1153_s22 = smov %s891_s23  ;;  %s1154_s23 = smov %s976_s30 }
 0x40e   : > { %s1155_s24 = smov %s965_s27  ;;  %22 = sbr.rel (!%p20_p5) target bundleno = 5 (0x5), region = 100 }
 0x415   :  { %608 = vsyncpa [#allocation3], 1 }
 0x416   :  { %610 = vsyncpa [#allocation3 + $0x1], 1 }
 0x417   :  { %611 = vsyncpa [#allocation5], 1 }
 0x418   :  { %613 = vsyncpa [#allocation5 + $0x1], 1 }

</bundles_post_ra>
